<compile_context>
chip_gen: v5e
topology: v5e:2x2
jax: 0.10.0
libtpu: 0.0.40
codegen_flags: <defaults>
</compile_context>

<pallas_src>
import functools

import jax
import jax.numpy as jnp
from jax.experimental import pallas as pl
from jax.experimental.pallas import tpu as pltpu


_LANE = 128


def _cdiv(a, b):
    return -(-a // b)


def _round_up(a, b):
    return _cdiv(a, b) * b


def _tpu_params():
    """Returns (splits, vmem_budget_bytes) for the current TPU generation."""
    splits = 1
    vmem_capacity = 128 << 20  # v5e / v6e physical VMEM per TensorCore
    try:
        vmem_capacity = int(pltpu.get_tpu_info().vmem_capacity_bytes)
    except Exception:
        pass
    try:
        kind = jax.devices()[0].device_kind.lower()
    except Exception:
        kind = ""
    # v7x: 2 TensorCores per chip, 64 MiB VMEM per core -> split the scan.
    if "7" in kind or vmem_capacity <= (64 << 20):
        splits = 2
    budget = max(32 << 20, min(100 << 20, int(vmem_capacity * 0.70)))
    return splits, budget


def _dice_kernel(inp_ref, tgt_ref, out_ref, acc_ref, *, approx_recip):
    k = pl.program_id(1)

    @pl.when(k == 0)
    def _():
        acc_ref[...] = jnp.zeros_like(acc_ref)

    x = inp_ref[...]                       # (B, R, 128) float32
    t = tgt_ref[...]

    num = 2.0 * x * t + 1.0
    den = x + t + 1.0
    # EUP approximate reciprocal keeps the VALU free (kernel is HBM-bound).
    dice = num * pl.reciprocal(den, approx=approx_recip)

    # Lane-resident partial sums; defer the cross-lane reduce to the end.
    acc_ref[...] += jnp.sum(dice, axis=1)  # (B, 128)

    @pl.when(k == pl.num_programs(1) - 1)
    def _():
        out_ref[...] = jnp.sum(
            acc_ref[...], axis=-1, keepdims=True).astype(out_ref.dtype)  # (B, 1)


def dice_coeff(inputs, targets, *, approx_recip=True, max_block_rows=4096):
    """inputs/targets: (B, ...) -> (B,) mean soft dice per batch row."""
    B = inputs.shape[0]
    x = inputs.reshape(B, -1).astype(jnp.float32)
    t = targets.reshape(B, -1).astype(jnp.float32)
    N = x.shape[1]

    splits, vmem_budget = _tpu_params()

    # ---- block geometry ----------------------------------------------------
    n_rows = _cdiv(N, _LANE)                    # 128-lane rows of data
    rows_per_split_min = _cdiv(n_rows, splits)

    # 2 inputs x double-buffer x (B, R, 128) fp32 must fit ~80% of the budget.
    bytes_per_row = 2 * 2 * B * _LANE * 4
    r_cap = max(8, (int(vmem_budget * 0.8) // bytes_per_row) // 8 * 8)
    R = min(max_block_rows, r_cap, _round_up(rows_per_split_min, 8))
    R = max(8, (R // 8) * 8)

    rows_per_split = _round_up(rows_per_split_min, R)
    n_rows_padded = rows_per_split * splits
    pad = n_rows_padded * _LANE - N

    if pad:
        # dice term of (x=-0.5, t=1.0) is (2*-0.5*1+1)/(-0.5+1+1) = 0/1.5 = 0,
        # so padded elements contribute nothing to the per-row sum.
        x = jnp.pad(x, ((0, 0), (0, pad)), constant_values=-0.5)
        t = jnp.pad(t, ((0, 0), (0, pad)), constant_values=1.0)

    x3 = x.reshape(B, n_rows_padded, _LANE)
    t3 = t.reshape(B, n_rows_padded, _LANE)

    k_tiles = rows_per_split // R
    in_map = lambda s, k: (0, s * k_tiles + k, 0)

    partial = pl.pallas_call(
        functools.partial(_dice_kernel, approx_recip=approx_recip),
        out_shape=jax.ShapeDtypeStruct((splits, B, 1), jnp.float32),
        grid_spec=pltpu.PrefetchScalarGridSpec(
            num_scalar_prefetch=0,
            grid=(splits, k_tiles),
            in_specs=[
                pl.BlockSpec((B, R, _LANE), in_map),
                pl.BlockSpec((B, R, _LANE), in_map),
            ],
            out_specs=pl.BlockSpec((None, B, 1), lambda s, k: (s, 0, 0)),
            scratch_shapes=[pltpu.VMEM((B, _LANE), jnp.float32)],
        ),
        compiler_params=pltpu.CompilerParams(
            dimension_semantics=("parallel", "arbitrary"),
            vmem_limit_bytes=int(vmem_budget),
        ),
    )(x3, t3)

    total = jnp.sum(partial, axis=(0, 2))       # (B,) combine per-split partials
    return total / jnp.float32(N)


def dice_coeff_ref(inputs, targets):
    B = inputs.shape[0]
    x = inputs.reshape(B, -1).astype(jnp.float32)
    t = targets.reshape(B, -1).astype(jnp.float32)
    d = (2.0 * x * t + 1.0) / (x + t + 1.0)
    return d.mean(axis=1)


if __name__ == "__main__":
    key = jax.random.PRNGKey(0)
    k1, k2, k3, k4 = jax.random.split(key, 4)

    # Case 1: B=2, C=4, H=W=16  ->  N = 1024 (multiple of 128).
    B, C, H, W = 2, 4, 16, 16
    inputs = jax.random.uniform(k1, (B, C, H, W), dtype=jnp.float32)
    targets = (jax.random.uniform(k2, (B, C, H, W)) > 0.5).astype(jnp.float32)

    out = dice_coeff(inputs, targets)                         # approx EUP recip
    jax.block_until_ready(out)
    out_exact = dice_coeff(inputs, targets, approx_recip=False)
    jax.block_until_ready(out_exact)

    ref = dice_coeff_ref(inputs, targets)
    assert out.shape == (B,)
    assert jnp.allclose(out_exact, ref, rtol=1e-5, atol=1e-6), (out_exact, ref)
    assert jnp.allclose(out, ref, rtol=5e-3, atol=5e-3), (out, ref)

    # Case 2: ragged N = 300 (exercises the zero-contribution padding path).
    inputs2 = jax.random.uniform(k3, (2, 3, 10, 10), dtype=jnp.float32)
    targets2 = (jax.random.uniform(k4, (2, 3, 10, 10)) > 0.5).astype(jnp.float32)
    out2 = dice_coeff(inputs2, targets2)
    jax.block_until_ready(out2)
    ref2 = dice_coeff_ref(inputs2, targets2)
    assert jnp.allclose(out2, ref2, rtol=5e-3, atol=5e-3), (out2, ref2)

    print("KERNEL_OK")
</pallas_src>

<mosaic_0001>
module attributes {stable_mosaic.version = 11 : i64} {
  func.func @_dice_kernel(%arg0: i32, %arg1: i32, %arg2: memref<2x8x128xf32, #tpu.memory_space<vmem>>, %arg3: memref<2x8x128xf32, #tpu.memory_space<vmem>>, %arg4: memref<1x2x1xf32, #tpu.memory_space<vmem>>, %arg5: memref<2x128xf32, #tpu.memory_space<vmem>>) attributes {dimension_semantics = [#tpu.dimension_semantics<parallel>, #tpu.dimension_semantics<arbitrary>], iteration_bounds = array<i64: 1, 1>, scalar_prefetch = 0 : i64, scratch_operands = 1 : i64, tpu.core_type = #tpu.core_type<tc>, window_params = [{transform_indices = @transform_0, window_bounds = array<i64: 2, 8, 128>}, {transform_indices = @transform_1, window_bounds = array<i64: 2, 8, 128>}, {transform_indices = @transform_2, window_bounds = array<i64: 1, 2, 1>}]} {
    %c0_i32 = arith.constant 0 : i32
    %0 = arith.cmpi eq, %arg1, %c0_i32 : i32
    %1 = arith.extui %0 : i1 to i32
    %c0_i32_0 = arith.constant 0 : i32
    %2 = arith.cmpi ne, %1, %c0_i32_0 : i32
    scf.if %2 {
      %cst_15 = arith.constant 0.000000e+00 : f32
      %22 = vector.broadcast %cst_15 : f32 to vector<2x128xf32>
      %c0_16 = arith.constant 0 : index
      %c0_17 = arith.constant 0 : index
      %23 = vector.load %arg5[%c0_16, %c0_17] : memref<2x128xf32, #tpu.memory_space<vmem>>, vector<2x128xf32>
      tpu.vector_store %arg5[%c0_16, %c0_17], %22 {strides = array<i32>} : memref<2x128xf32, #tpu.memory_space<vmem>>, vector<2x128xf32>,
    } else {
    }
    %c0 = arith.constant 0 : index
    %c0_1 = arith.constant 0 : index
    %c0_2 = arith.constant 0 : index
    %3 = vector.load %arg2[%c0, %c0_1, %c0_2] : memref<2x8x128xf32, #tpu.memory_space<vmem>>, vector<2x8x128xf32>
    %c0_3 = arith.constant 0 : index
    %c0_4 = arith.constant 0 : index
    %c0_5 = arith.constant 0 : index
    %4 = vector.load %arg3[%c0_3, %c0_4, %c0_5] : memref<2x8x128xf32, #tpu.memory_space<vmem>>, vector<2x8x128xf32>
    %cst = arith.constant 2.000000e+00 : f32
    %5 = vector.broadcast %cst : f32 to vector<2x8x128xf32>
    %6 = arith.mulf %5, %3 : vector<2x8x128xf32>
    %7 = arith.mulf %6, %4 : vector<2x8x128xf32>
    %cst_6 = arith.constant 1.000000e+00 : f32
    %8 = vector.broadcast %cst_6 : f32 to vector<2x8x128xf32>
    %9 = arith.addf %7, %8 : vector<2x8x128xf32>
    %10 = arith.addf %3, %4 : vector<2x8x128xf32>
    %cst_7 = arith.constant 1.000000e+00 : f32
    %11 = vector.broadcast %cst_7 : f32 to vector<2x8x128xf32>
    %12 = arith.addf %10, %11 : vector<2x8x128xf32>
    %13 = tpu.reciprocal %12 {approx = true} : vector<2x8x128xf32> -> vector<2x8x128xf32>
    %14 = arith.mulf %9, %13 : vector<2x8x128xf32>
    %c0_8 = arith.constant 0 : index
    %c0_9 = arith.constant 0 : index
    %15 = vector.load %arg5[%c0_8, %c0_9] : memref<2x128xf32, #tpu.memory_space<vmem>>, vector<2x128xf32>
    %cst_10 = arith.constant dense<0.000000e+00> : vector<2x128xf32>
    %16 = vector.multi_reduction <add>, %14, %cst_10 [1] : vector<2x8x128xf32> to vector<2x128xf32>
    %17 = arith.addf %15, %16 : vector<2x128xf32>
    %c0_11 = arith.constant 0 : index
    %c0_12 = arith.constant 0 : index
    %18 = vector.load %arg5[%c0_11, %c0_12] : memref<2x128xf32, #tpu.memory_space<vmem>>, vector<2x128xf32>
    tpu.vector_store %arg5[%c0_11, %c0_12], %17 {strides = array<i32>} : memref<2x128xf32, #tpu.memory_space<vmem>>, vector<2x128xf32>,
    %c0_i32_13 = arith.constant 0 : i32
    %19 = arith.cmpi eq, %arg1, %c0_i32_13 : i32
    %20 = arith.extui %19 : i1 to i32
    %c0_i32_14 = arith.constant 0 : i32
    %21 = arith.cmpi ne, %20, %c0_i32_14 : i32
    scf.if %21 {
      %c0_15 = arith.constant 0 : index
      %c0_16 = arith.constant 0 : index
      %22 = vector.load %arg5[%c0_15, %c0_16] : memref<2x128xf32, #tpu.memory_space<vmem>>, vector<2x128xf32>
      %cst_17 = arith.constant dense<0.000000e+00> : vector<2xf32>
      %23 = vector.multi_reduction <add>, %22, %cst_17 [1] : vector<2x128xf32> to vector<2xf32>
      %24 = vector.shape_cast %23 : vector<2xf32> to vector<2x1xf32>
      %c0_18 = arith.constant 0 : index
      %c0_19 = arith.constant 0 : index
      %c0_20 = arith.constant 0 : index
      %25 = vector.load %arg4[%c0_18, %c0_19, %c0_20] : memref<1x2x1xf32, #tpu.memory_space<vmem>>, vector<1x2x1xf32>
      %26 = vector.shape_cast %25 : vector<1x2x1xf32> to vector<2x1xf32>
      %27 = vector.shape_cast %24 : vector<2x1xf32> to vector<1x2x1xf32>
      tpu.vector_store %arg4[%c0_18, %c0_19, %c0_20], %27 {strides = array<i32>} : memref<1x2x1xf32, #tpu.memory_space<vmem>>, vector<1x2x1xf32>,
    } else {
    }
    return
  }
  func.func @transform_0(%arg0: i32, %arg1: i32) -> (i32, i32, i32) {
    %c1_i32 = arith.constant 1 : i32
    %0 = arith.muli %arg0, %c1_i32 : i32
    %1 = arith.addi %0, %arg1 : i32
    %c0_i32 = arith.constant 0 : i32
    %c0_i32_0 = arith.constant 0 : i32
    %c0_i32_1 = arith.constant 0 : i32
    return %c0_i32, %1, %c0_i32_0 : i32, i32, i32
  }
  func.func @transform_1(%arg0: i32, %arg1: i32) -> (i32, i32, i32) {
    %c1_i32 = arith.constant 1 : i32
    %0 = arith.muli %arg0, %c1_i32 : i32
    %1 = arith.addi %0, %arg1 : i32
    %c0_i32 = arith.constant 0 : i32
    %c0_i32_0 = arith.constant 0 : i32
    %c0_i32_1 = arith.constant 0 : i32
    return %c0_i32, %1, %c0_i32_0 : i32, i32, i32
  }
  func.func @transform_2(%arg0: i32, %arg1: i32) -> (i32, i32, i32) {
    %c0_i32 = arith.constant 0 : i32
    %c0_i32_0 = arith.constant 0 : i32
    %c0_i32_1 = arith.constant 0 : i32
    return %arg0, %c0_i32, %c0_i32_0 : i32, i32, i32
  }
}

</mosaic_0001>

<bundles_post_ra>
// kernel: tpu_custom_call.1
= control target key start
LH: loop header
LB: loop body
LE: loop exit
PB: predicated region body
PF: predicated region fallthrough
CT: control target
= control target key end

     0   :  { %7 = vsyncpa [#allocation4], 0  ;;  %s200_s0 = inlined_call_operand.hbm [shape: f32[2,8,128], index: 0, kind: input, shape index: {}]   ;;  %s201_s1 = inlined_call_operand.hbm [shape: f32[2,8,128], index: 1, kind: input, shape index: {}]   ;;  %s202_s2 = inlined_call_operand.vmem [shape: f32[1,2,1], index: 2, kind: output, shape index: {}]  }
   0x1   :  { %s16_s11 = sshll.u32 %s200_s0, 4  ;;  %s17_s11 = int_to_ptr.hbm [resolvable:$true] %s16_s11 }
   0x2   :  { %8 = vsyncpa [#allocation6], 0  ;;  %s171_s12 = smov [#allocation3]   ;;  %s32_s16 = sshll.u32 %s201_s1, 4  ;;  %s33_s16 = int_to_ptr.hbm [resolvable:$true] %s32_s16 }
   0x3   :  { %s18_s13 = sshll.u32 %s171_s12, 4  ;;  %s172_s17 = smov 128   ;;  %s19_s13 = int_to_ptr.vmem [resolvable:$true] %s18_s13 }
   0x4   :  { %s173_s18 = smov 8   ;;  %s174_s19 = smov [#allocation5]  }
   0x5   :  { %24 = dma.hbm_to_vmem [thread:$0]  %s17_s11, 256, %s19_s13, [#allocation4], %s172_s17, %s172_s17, %s173_s18  }
   0x6   :  { %s34_s20 = sshll.u32 %s174_s19, 4  ;;  %s35_s20 = int_to_ptr.vmem [resolvable:$true] %s34_s20 }
   0x7   :  { %40 = dma.hbm_to_vmem [thread:$0]  %s33_s16, 256, %s35_s20, [#allocation6], %s172_s17, %s172_s17, %s173_s18  }
   0x8   :  { %167 = dma.done.wait [#allocation4], 256  }
   0x9   :  { %168 = vsyncadd [#allocation4], 4294967040 }
   0xa   :  { %169 = dma.done.wait [#allocation6], 256  }
   0xb   :  { %170 = vsyncadd [#allocation6], 4294967040  ;;  %v175_v0 = vmov 0.0   ;;  %v56_v1 = vld [vmem:[#allocation3] sm:$0xff]  ;;  %v57_v2 = vld [vmem:[#allocation3 + $0x8] sm:$0xff]  ;;  %vm89_vm0 = vcmask 1041409  }
   0xc   :  { %55 = vst [vmem:[#allocation2] sm:$0x3] %v175_v0  ;;  %v58_v3 = vld [vmem:[#allocation5] sm:$0xff]  ;;  %v59_v4 = vld [vmem:[#allocation5 + $0x8] sm:$0xff]  ;;  %v60_v5 = vmul.f32 2.0, %v56_v1  ;;  %v61_v6 = vmul.f32 2.0, %v57_v2 }
   0xd   :  { %v66_v7 = vadd.f32 %v58_v3, %v56_v1  ;;  %v67_v8 = vadd.f32 %v59_v4, %v57_v2  ;;  %vm98_vm1 = vcmask 1041408   ;;  %vm102_vm2 = vcmask 1024  }
   0xe   :  { %v62_v10 = vmul.f32 %v60_v5, %v58_v3  ;;  %v63_v12 = vmul.f32 %v61_v6, %v59_v4 }
   0xf   :  { %v68_v9 = vadd.f32 1.0, %v66_v7  ;;  %v69_v11 = vadd.f32 1.0, %v67_v8 }
  0x10   :  { %v64_v13 = vadd.f32 1.0, %v62_v10  ;;  %v65_v14 = vadd.f32 1.0, %v63_v12 }
  0x11   :  { %115 = vrcp.f32 %v68_v9 }
  0x12   :  { %117 = vrcp.f32 %v69_v11 }
  0x13   :  { %v74_v30 = vld [vmem:[#allocation2] sm:$0x3] }
  0x17   :  { %v116_v15 = vpop.eup %115 }
  0x18   :  { %v118_v16 = vpop.eup %117  ;;  %v72_v17 = vmul.f32 %v116_v15, %v64_v13 }
  0x19   :  { %v73_v18 = vmul.f32 %v118_v16, %v65_v14 }
  0x1a   :  { %v75_v19 = vrot.slane %v72_v17, 4 }
  0x1b   :  { %v81_v20 = vrot.slane %v73_v18, 4 }
  0x1c   :  { %v76_v21 = vadd.f32 %v75_v19, %v72_v17 }
  0x1d   :  { %v82_v22 = vadd.f32 %v81_v20, %v73_v18 }
  0x1e   :  { %v77_v23 = vrot.slane %v76_v21, 2 }
  0x1f   :  { %v83_v24 = vrot.slane %v82_v22, 2 }
  0x20   :  { %v78_v25 = vadd.f32 %v77_v23, %v76_v21 }
  0x21   :  { %v84_v26 = vadd.f32 %v83_v24, %v82_v22 }
  0x22   :  { %v79_v27 = vrot.slane %v78_v25, 1 }
  0x23   :  { %v85_v28 = vrot.slane %v84_v26, 1 }
  0x24   :  { %v80_v29 = vadd.f32 %v79_v27, %v78_v25 }
  0x25   :  { %v86_v31 = vadd.f32 %v85_v28, %v84_v26 }
  0x27   :  { %v90_v32 = vsel %vm89_vm0, %v86_v31, %v80_v29 }
  0x28   :  { %v92_v33 = vadd.f32 %v90_v32, %v74_v30 }
  0x2a   :  { %93 = vst [vmem:[#allocation2] sm:$0x3] %v92_v33 }
  0x31   :  { %v97_v34 = vld [vmem:[#allocation2] sm:$0x3] }
  0x32   :  { %v99_v35 = vsel %vm98_vm1, %v97_v34, 0.0 }
  0x33   :  { %100 = vadd.xlane.f32.xlu0 %v99_v35 }
  0xa6   :  { %v101_v36 = vpop.xlane.xlu0 %100 }
  0xa7   :  { %103 = vst.msk [vmem:[%s202_s2] sm:$0x3] %vm102_vm2, %v101_v36 }
  0xa8   :  { %108 = vsyncpa [#allocation4], 1 }
  0xa9   :  { %109 = vsyncpa [#allocation6], 1 }

</bundles_post_ra>
